<compile_context>
chip_gen: v6e
topology: v6e:2x2x1
jax: 0.10.0
libtpu: 0.0.40
codegen_flags: <defaults>
</compile_context>

<pallas_src>
import functools

import jax
import jax.numpy as jnp
from jax.experimental import pallas as pl
from jax.experimental.pallas import tpu as pltpu


def _mha_kernel(q_ref, k_ref, v_ref, mask_ref,
                wq_ref, wk_ref, wv_ref, wfc_ref,
                out_ref, attn_ref,
                *, n_head, d_k, d_v):
    """One grid step: one batch element x one L_q tile, all heads at once."""
    inv_temperature = 1.0 / (d_k ** 0.5)

    q = q_ref[0]          # (Tq, d_model)  -- input dtype (bf16 in production)
    k = k_ref[0]          # (Lk, d_model)
    v = v_ref[0]          # (Lk, d_model)

    # Additive mask bias, computed once for all heads.
    bias = jnp.where(mask_ref[...] == 1,
                     jnp.float32(-1e9), jnp.float32(0.0))        # (Tq, Lk)

    # Input projections: big MXU matmuls, f32 accumulation. Scale Q once.
    Q = jnp.dot(q, wq_ref[...], preferred_element_type=jnp.float32) * inv_temperature
    K = jnp.dot(k, wk_ref[...], preferred_element_type=jnp.float32)
    V = jnp.dot(v, wv_ref[...], preferred_element_type=jnp.float32)

    Tq = Q.shape[0]
    Lk = K.shape[0]

    # Head-major layout: (H, L, d).
    Qh = jnp.swapaxes(Q.reshape(Tq, n_head, d_k), 0, 1)          # (H, Tq, d_k)
    Kh = jnp.swapaxes(K.reshape(Lk, n_head, d_k), 0, 1)          # (H, Lk, d_k)
    Vh = jnp.swapaxes(V.reshape(Lk, n_head, d_v), 0, 1)          # (H, Lk, d_v)

    # Scores for all heads in one batched MXU pass.
    scores = jnp.einsum('hqd,hkd->hqk', Qh, Kh,
                        preferred_element_type=jnp.float32)      # (H, Tq, Lk)
    scores = scores + bias[None, :, :]

    # Softmax (f32); reciprocal in the otherwise-idle EUP slot.
    m = jnp.max(scores, axis=-1, keepdims=True)
    e = jnp.exp(scores - m)
    denom = jnp.sum(e, axis=-1, keepdims=True)
    p = e * pl.reciprocal(denom, approx=True)                    # (H, Tq, Lk)

    attn_ref[0] = p.astype(attn_ref.dtype)

    # attention @ V, batched over heads.
    pv = jnp.einsum('hqk,hkv->hqv', p, Vh,
                    preferred_element_type=jnp.float32)          # (H, Tq, d_v)

    # Output projection: contract heads directly (no lane-axis concat).
    wfc3 = wfc_ref[...].reshape(n_head, d_v, -1)                 # (H, d_v, d_model)
    out_h = jnp.einsum('hqv,hvd->hqd', pv, wfc3,
                       preferred_element_type=jnp.float32)       # (H, Tq, d_model)
    out = jnp.sum(out_h, axis=0)                                 # (Tq, d_model)
    out_ref[0] = out.astype(out_ref.dtype)


def multi_head_attention(q, k, v, attn_mask, wq, wk, wv, wfc,
                         *, n_head, d_k, d_v, q_tile=128):
    """q,k,v: (B, L, d_model); attn_mask: (L_q, L_k) int32; weights: (in, out)."""
    B, L_q, d_model = q.shape
    L_k = k.shape[1]

    tq = min(q_tile, L_q)
    assert L_q % tq == 0, "L_q must be divisible by the query tile"
    n_q_tiles = L_q // tq

    kernel = functools.partial(_mha_kernel, n_head=n_head, d_k=d_k, d_v=d_v)

    out, attn = pl.pallas_call(
        kernel,
        out_shape=(
            jax.ShapeDtypeStruct((B, L_q, d_model), q.dtype),
            jax.ShapeDtypeStruct((B, n_head, L_q, L_k), jnp.float32),
        ),
        grid_spec=pltpu.PrefetchScalarGridSpec(
            num_scalar_prefetch=0,
            grid=(B, n_q_tiles),
            in_specs=[
                pl.BlockSpec((1, tq, d_model), lambda b, i: (b, i, 0)),    # q tile
                pl.BlockSpec((1, L_k, d_model), lambda b, i: (b, 0, 0)),   # k
                pl.BlockSpec((1, L_k, d_model), lambda b, i: (b, 0, 0)),   # v
                pl.BlockSpec((tq, L_k), lambda b, i: (i, 0)),              # mask tile
                pl.BlockSpec(wq.shape, lambda b, i: (0, 0)),               # Wq
                pl.BlockSpec(wk.shape, lambda b, i: (0, 0)),               # Wk
                pl.BlockSpec(wv.shape, lambda b, i: (0, 0)),               # Wv
                pl.BlockSpec(wfc.shape, lambda b, i: (0, 0)),              # Wfc
            ],
            out_specs=[
                pl.BlockSpec((1, tq, d_model), lambda b, i: (b, i, 0)),
                pl.BlockSpec((1, n_head, tq, L_k), lambda b, i: (b, 0, i, 0)),
            ],
        ),
        compiler_params=pltpu.CompilerParams(
            dimension_semantics=("parallel", "parallel")),
    )(q, k, v, attn_mask, wq, wk, wv, wfc)
    return out, attn


def _reference(q, k, v, attn_mask, wq, wk, wv, wfc, *, n_head, d_k, d_v):
    """Plain-JAX reference mirroring the PyTorch forward (eval mode)."""
    B, L_q, _ = q.shape
    L_k = k.shape[1]
    Q = (q @ wq).reshape(B, L_q, n_head, d_k).transpose(0, 2, 1, 3)
    K = (k @ wk).reshape(B, L_k, n_head, d_k).transpose(0, 2, 1, 3)
    V = (v @ wv).reshape(B, L_k, n_head, d_v).transpose(0, 2, 1, 3)
    scores = jnp.einsum("bhqd,bhkd->bhqk", Q / (d_k ** 0.5), K)
    scores = jnp.where(attn_mask[None, None] == 1, -1e9, scores)
    attn = jax.nn.softmax(scores, axis=-1)
    out = jnp.einsum("bhqk,bhkd->bhqd", attn, V)
    out = out.transpose(0, 2, 1, 3).reshape(B, L_q, n_head * d_v)
    return out @ wfc, attn


if __name__ == "__main__":
    # Small, module-consistent shapes.
    B, L, d_model = 2, 8, 32
    n_head, d_k, d_v = 4, 8, 8

    key = jax.random.PRNGKey(0)
    kq, kk, kv, kwq, kwk, kwv, kwf = jax.random.split(key, 7)

    q = jax.random.normal(kq, (B, L, d_model), dtype=jnp.float32)
    k = jax.random.normal(kk, (B, L, d_model), dtype=jnp.float32)
    v = jax.random.normal(kv, (B, L, d_model), dtype=jnp.float32)

    # Deterministic "Linear" weights, stored as (in_features, out_features).
    scale = 1.0 / (d_model ** 0.5)
    wq = jax.random.uniform(kwq, (d_model, n_head * d_k), jnp.float32, -scale, scale)
    wk = jax.random.uniform(kwk, (d_model, n_head * d_k), jnp.float32, -scale, scale)
    wv = jax.random.uniform(kwv, (d_model, n_head * d_v), jnp.float32, -scale, scale)
    wfc = jax.random.uniform(kwf, (n_head * d_v, d_model), jnp.float32, -scale, scale)

    # Causal mask (1 = masked), exercising the masked_fill path.
    attn_mask = jnp.triu(jnp.ones((L, L), jnp.int32), k=1).astype(jnp.int32)

    out, attn = multi_head_attention(q, k, v, attn_mask, wq, wk, wv, wfc,
                                     n_head=n_head, d_k=d_k, d_v=d_v)
    jax.block_until_ready((out, attn))

    ref_out, ref_attn = _reference(q, k, v, attn_mask, wq, wk, wv, wfc,
                                   n_head=n_head, d_k=d_k, d_v=d_v)
    # approx reciprocal in softmax -> allow ~1e-3 tolerance.
    assert jnp.allclose(out, ref_out, atol=2e-3, rtol=2e-3)
    assert jnp.allclose(attn, ref_attn, atol=1e-3, rtol=1e-3)

    print("KERNEL_OK")
</pallas_src>

<mosaic_0001>
module attributes {stable_mosaic.version = 11 : i64} {
  func.func @_mha_kernel(%arg0: i32, %arg1: i32, %arg2: memref<1x8x32xf32, #tpu.memory_space<vmem>>, %arg3: memref<1x8x32xf32, #tpu.memory_space<vmem>>, %arg4: memref<1x8x32xf32, #tpu.memory_space<vmem>>, %arg5: memref<8x8xi32, #tpu.memory_space<vmem>>, %arg6: memref<32x32xf32, #tpu.memory_space<vmem>>, %arg7: memref<32x32xf32, #tpu.memory_space<vmem>>, %arg8: memref<32x32xf32, #tpu.memory_space<vmem>>, %arg9: memref<32x32xf32, #tpu.memory_space<vmem>>, %arg10: memref<1x8x32xf32, #tpu.memory_space<vmem>>, %arg11: memref<1x4x8x8xf32, #tpu.memory_space<vmem>>) attributes {dimension_semantics = [#tpu.dimension_semantics<parallel>, #tpu.dimension_semantics<parallel>], iteration_bounds = array<i64: 2, 1>, scalar_prefetch = 0 : i64, scratch_operands = 0 : i64, tpu.core_type = #tpu.core_type<tc>, window_params = [{transform_indices = @transform_0, window_bounds = array<i64: 1, 8, 32>}, {transform_indices = @transform_1, window_bounds = array<i64: 1, 8, 32>}, {transform_indices = @transform_2, window_bounds = array<i64: 1, 8, 32>}, {transform_indices = @transform_3, window_bounds = array<i64: 8, 8>}, {pipeline_mode = #tpu.pipeline_mode<synchronous>, transform_indices = @transform_4, window_bounds = array<i64: 32, 32>}, {pipeline_mode = #tpu.pipeline_mode<synchronous>, transform_indices = @transform_5, window_bounds = array<i64: 32, 32>}, {pipeline_mode = #tpu.pipeline_mode<synchronous>, transform_indices = @transform_6, window_bounds = array<i64: 32, 32>}, {pipeline_mode = #tpu.pipeline_mode<synchronous>, transform_indices = @transform_7, window_bounds = array<i64: 32, 32>}, {transform_indices = @transform_8, window_bounds = array<i64: 1, 8, 32>}, {transform_indices = @transform_9, window_bounds = array<i64: 1, 4, 8, 8>}]} {
    %c0 = arith.constant 0 : index
    %c0_0 = arith.constant 0 : index
    %c0_1 = arith.constant 0 : index
    %0 = vector.load %arg2[%c0, %c0_0, %c0_1] : memref<1x8x32xf32, #tpu.memory_space<vmem>>, vector<1x8x32xf32>
    %1 = vector.shape_cast %0 : vector<1x8x32xf32> to vector<8x32xf32>
    %c0_2 = arith.constant 0 : index
    %c0_3 = arith.constant 0 : index
    %c0_4 = arith.constant 0 : index
    %2 = vector.load %arg3[%c0_2, %c0_3, %c0_4] : memref<1x8x32xf32, #tpu.memory_space<vmem>>, vector<1x8x32xf32>
    %3 = vector.shape_cast %2 : vector<1x8x32xf32> to vector<8x32xf32>
    %c0_5 = arith.constant 0 : index
    %c0_6 = arith.constant 0 : index
    %c0_7 = arith.constant 0 : index
    %4 = vector.load %arg4[%c0_5, %c0_6, %c0_7] : memref<1x8x32xf32, #tpu.memory_space<vmem>>, vector<1x8x32xf32>
    %5 = vector.shape_cast %4 : vector<1x8x32xf32> to vector<8x32xf32>
    %c0_8 = arith.constant 0 : index
    %c0_9 = arith.constant 0 : index
    %6 = vector.load %arg5[%c0_8, %c0_9] : memref<8x8xi32, #tpu.memory_space<vmem>>, vector<8x8xi32>
    %c1_i32 = arith.constant 1 : i32
    %7 = vector.broadcast %c1_i32 : i32 to vector<8x8xi32>
    %8 = arith.cmpi eq, %6, %7 : vector<8x8xi32>
    %cst = arith.constant -1.000000e+09 : f32
    %cst_10 = arith.constant 0.000000e+00 : f32
    %9 = vector.broadcast %cst : f32 to vector<8x8xf32>
    %10 = vector.broadcast %cst_10 : f32 to vector<8x8xf32>
    %11 = arith.select %8, %9, %10 : vector<8x8xi1>, vector<8x8xf32>
    %c0_11 = arith.constant 0 : index
    %c0_12 = arith.constant 0 : index
    %12 = vector.load %arg6[%c0_11, %c0_12] : memref<32x32xf32, #tpu.memory_space<vmem>>, vector<32x32xf32>
    %cst_13 = arith.constant dense<0.000000e+00> : vector<8x32xf32>
    %13 = tpu.matmul %1, %12, %cst_13 {dimension_numbers = #tpu.dot_dimension_numbers<[1], [0], [0], [1], [0, 0, 1, 1], [], []>} : vector<8x32xf32>, vector<32x32xf32>, vector<8x32xf32> -> vector<8x32xf32>
    %cst_14 = arith.constant 0.353553385 : f32
    %14 = vector.broadcast %cst_14 : f32 to vector<8x32xf32>
    %15 = arith.mulf %13, %14 : vector<8x32xf32>
    %c0_15 = arith.constant 0 : index
    %c0_16 = arith.constant 0 : index
    %16 = vector.load %arg7[%c0_15, %c0_16] : memref<32x32xf32, #tpu.memory_space<vmem>>, vector<32x32xf32>
    %cst_17 = arith.constant dense<0.000000e+00> : vector<8x32xf32>
    %17 = tpu.matmul %3, %16, %cst_17 {dimension_numbers = #tpu.dot_dimension_numbers<[1], [0], [0], [1], [0, 0, 1, 1], [], []>} : vector<8x32xf32>, vector<32x32xf32>, vector<8x32xf32> -> vector<8x32xf32>
    %c0_18 = arith.constant 0 : index
    %c0_19 = arith.constant 0 : index
    %18 = vector.load %arg8[%c0_18, %c0_19] : memref<32x32xf32, #tpu.memory_space<vmem>>, vector<32x32xf32>
    %cst_20 = arith.constant dense<0.000000e+00> : vector<8x32xf32>
    %19 = tpu.matmul %5, %18, %cst_20 {dimension_numbers = #tpu.dot_dimension_numbers<[1], [0], [0], [1], [0, 0, 1, 1], [], []>} : vector<8x32xf32>, vector<32x32xf32>, vector<8x32xf32> -> vector<8x32xf32>
    %20 = vector.shape_cast %15 : vector<8x32xf32> to vector<8x4x8xf32>
    %21 = tpu.transpose %20, [1, 0, 2] : vector<8x4x8xf32> -> vector<4x8x8xf32>
    %22 = vector.shape_cast %17 : vector<8x32xf32> to vector<8x4x8xf32>
    %23 = tpu.transpose %22, [1, 0, 2] : vector<8x4x8xf32> -> vector<4x8x8xf32>
    %24 = vector.shape_cast %19 : vector<8x32xf32> to vector<8x4x8xf32>
    %25 = tpu.transpose %24, [1, 0, 2] : vector<8x4x8xf32> -> vector<4x8x8xf32>
    "tpu.trace_start"() <{level = 10 : i32, message = "hqd,hkd->hqk"}> : () -> ()
    %cst_21 = arith.constant dense<0.000000e+00> : vector<4x8x8xf32>
    %26 = tpu.matmul %21, %23, %cst_21 {dimension_numbers = #tpu.dot_dimension_numbers<[2], [2], [1], [1], [0, 0, 0, 1, 1, 1], [0], [0]>} : vector<4x8x8xf32>, vector<4x8x8xf32>, vector<4x8x8xf32> -> vector<4x8x8xf32>
    "tpu.trace_stop"() : () -> ()
    %27 = vector.shape_cast %11 : vector<8x8xf32> to vector<1x8x8xf32>
    %28 = vector.broadcast %27 : vector<1x8x8xf32> to vector<4x8x8xf32>
    %29 = arith.addf %26, %28 : vector<4x8x8xf32>
    %cst_22 = arith.constant dense<0xFF800000> : vector<4x8xf32>
    %30 = vector.multi_reduction <maximumf>, %29, %cst_22 [2] : vector<4x8x8xf32> to vector<4x8xf32>
    %31 = vector.shape_cast %30 : vector<4x8xf32> to vector<4x8x1xf32>
    %32 = vector.broadcast %31 : vector<4x8x1xf32> to vector<4x8x8xf32>
    %33 = arith.subf %29, %32 : vector<4x8x8xf32>
    %34 = math.exp %33 : vector<4x8x8xf32>
    %cst_23 = arith.constant dense<0.000000e+00> : vector<4x8xf32>
    %35 = vector.multi_reduction <add>, %34, %cst_23 [2] : vector<4x8x8xf32> to vector<4x8xf32>
    %36 = vector.shape_cast %35 : vector<4x8xf32> to vector<4x8x1xf32>
    %37 = tpu.reciprocal %36 {approx = true} : vector<4x8x1xf32> -> vector<4x8x1xf32>
    %38 = vector.broadcast %37 : vector<4x8x1xf32> to vector<4x8x8xf32>
    %39 = arith.mulf %34, %38 : vector<4x8x8xf32>
    %c0_24 = arith.constant 0 : index
    %c0_25 = arith.constant 0 : index
    %c0_26 = arith.constant 0 : index
    %c0_27 = arith.constant 0 : index
    %40 = vector.load %arg11[%c0_24, %c0_25, %c0_26, %c0_27] : memref<1x4x8x8xf32, #tpu.memory_space<vmem>>, vector<1x4x8x8xf32>
    %41 = vector.shape_cast %40 : vector<1x4x8x8xf32> to vector<4x8x8xf32>
    %42 = vector.shape_cast %39 : vector<4x8x8xf32> to vector<1x4x8x8xf32>
    tpu.vector_store %arg11[%c0_24, %c0_25, %c0_26, %c0_27], %42 {strides = array<i32>} : memref<1x4x8x8xf32, #tpu.memory_space<vmem>>, vector<1x4x8x8xf32>,
    "tpu.trace_start"() <{level = 10 : i32, message = "hqk,hkv->hqv"}> : () -> ()
    %cst_28 = arith.constant dense<0.000000e+00> : vector<4x8x8xf32>
    %43 = tpu.matmul %39, %25, %cst_28 {dimension_numbers = #tpu.dot_dimension_numbers<[2], [1], [1], [2], [0, 0, 0, 1, 1, 2], [0], [0]>} : vector<4x8x8xf32>, vector<4x8x8xf32>, vector<4x8x8xf32> -> vector<4x8x8xf32>
    "tpu.trace_stop"() : () -> ()
    %c0_29 = arith.constant 0 : index
    %c0_30 = arith.constant 0 : index
    %44 = vector.load %arg9[%c0_29, %c0_30] : memref<32x32xf32, #tpu.memory_space<vmem>>, vector<32x32xf32>
    %45 = vector.shape_cast %44 : vector<32x32xf32> to vector<4x8x32xf32>
    "tpu.trace_start"() <{level = 10 : i32, message = "hqv,hvd->hqd"}> : () -> ()
    %cst_31 = arith.constant dense<0.000000e+00> : vector<4x8x32xf32>
    %46 = tpu.matmul %43, %45, %cst_31 {dimension_numbers = #tpu.dot_dimension_numbers<[2], [1], [1], [2], [0, 0, 0, 1, 1, 2], [0], [0]>} : vector<4x8x8xf32>, vector<4x8x32xf32>, vector<4x8x32xf32> -> vector<4x8x32xf32>
    "tpu.trace_stop"() : () -> ()
    %cst_32 = arith.constant dense<0.000000e+00> : vector<8x32xf32>
    %47 = vector.multi_reduction <add>, %46, %cst_32 [0] : vector<4x8x32xf32> to vector<8x32xf32>
    %c0_33 = arith.constant 0 : index
    %c0_34 = arith.constant 0 : index
    %c0_35 = arith.constant 0 : index
    %48 = vector.load %arg10[%c0_33, %c0_34, %c0_35] : memref<1x8x32xf32, #tpu.memory_space<vmem>>, vector<1x8x32xf32>
    %49 = vector.shape_cast %48 : vector<1x8x32xf32> to vector<8x32xf32>
    %50 = vector.shape_cast %47 : vector<8x32xf32> to vector<1x8x32xf32>
    tpu.vector_store %arg10[%c0_33, %c0_34, %c0_35], %50 {strides = array<i32>} : memref<1x8x32xf32, #tpu.memory_space<vmem>>, vector<1x8x32xf32>,
    return
  }
  func.func @transform_0(%arg0: i32, %arg1: i32) -> (i32, i32, i32) {
    %c0_i32 = arith.constant 0 : i32
    %c0_i32_0 = arith.constant 0 : i32
    return %arg0, %arg1, %c0_i32 : i32, i32, i32
  }
  func.func @transform_1(%arg0: i32, %arg1: i32) -> (i32, i32, i32) {
    %c0_i32 = arith.constant 0 : i32
    %c0_i32_0 = arith.constant 0 : i32
    %c0_i32_1 = arith.constant 0 : i32
    return %arg0, %c0_i32, %c0_i32_0 : i32, i32, i32
  }
  func.func @transform_2(%arg0: i32, %arg1: i32) -> (i32, i32, i32) {
    %c0_i32 = arith.constant 0 : i32
    %c0_i32_0 = arith.constant 0 : i32
    %c0_i32_1 = arith.constant 0 : i32
    return %arg0, %c0_i32, %c0_i32_0 : i32, i32, i32
  }
  func.func @transform_3(%arg0: i32, %arg1: i32) -> (i32, i32) {
    %c0_i32 = arith.constant 0 : i32
    %c0_i32_0 = arith.constant 0 : i32
    return %arg1, %c0_i32 : i32, i32
  }
  func.func @transform_4(%arg0: i32, %arg1: i32) -> (i32, i32) {
    %c0_i32 = arith.constant 0 : i32
    %c0_i32_0 = arith.constant 0 : i32
    %c0_i32_1 = arith.constant 0 : i32
    return %c0_i32, %c0_i32_0 : i32, i32
  }
  func.func @transform_5(%arg0: i32, %arg1: i32) -> (i32, i32) {
    %c0_i32 = arith.constant 0 : i32
    %c0_i32_0 = arith.constant 0 : i32
    %c0_i32_1 = arith.constant 0 : i32
    return %c0_i32, %c0_i32_0 : i32, i32
  }
  func.func @transform_6(%arg0: i32, %arg1: i32) -> (i32, i32) {
    %c0_i32 = arith.constant 0 : i32
    %c0_i32_0 = arith.constant 0 : i32
    %c0_i32_1 = arith.constant 0 : i32
    return %c0_i32, %c0_i32_0 : i32, i32
  }
  func.func @transform_7(%arg0: i32, %arg1: i32) -> (i32, i32) {
    %c0_i32 = arith.constant 0 : i32
    %c0_i32_0 = arith.constant 0 : i32
    %c0_i32_1 = arith.constant 0 : i32
    return %c0_i32, %c0_i32_0 : i32, i32
  }
  func.func @transform_8(%arg0: i32, %arg1: i32) -> (i32, i32, i32) {
    %c0_i32 = arith.constant 0 : i32
    %c0_i32_0 = arith.constant 0 : i32
    return %arg0, %arg1, %c0_i32 : i32, i32, i32
  }
  func.func @transform_9(%arg0: i32, %arg1: i32) -> (i32, i32, i32, i32) {
    %c0_i32 = arith.constant 0 : i32
    %c0_i32_0 = arith.constant 0 : i32
    %c0_i32_1 = arith.constant 0 : i32
    return %arg0, %c0_i32, %arg1, %c0_i32_0 : i32, i32, i32, i32
  }
}

</mosaic_0001>

<bundles_post_ra>
// kernel: tpu_custom_call.1
= control target key start
LH: loop header
LB: loop body
LE: loop exit
PB: predicated region body
PF: predicated region fallthrough
CT: control target
= control target key end

     0   :  { %s3631_s0 = inlined_call_operand.hbm [shape: f32[2,8,32], index: 0, kind: input, shape index: {}]   ;;  %s3632_s1 = inlined_call_operand.hbm [shape: f32[2,8,32], index: 1, kind: input, shape index: {}]   ;;  %s3633_s2 = inlined_call_operand.hbm [shape: f32[2,8,32], index: 2, kind: input, shape index: {}]   ;;  %s3634_s3 = inlined_call_operand.hbm [shape: s32[8,8], index: 3, kind: input, shape index: {}]   ;;  %s3635_s4 = inlined_call_operand.hbm [shape: f32[32,32], index: 4, kind: input, shape index: {}]   ;;  %s3636_s5 = inlined_call_operand.hbm [shape: f32[32,32], index: 5, kind: input, shape index: {}]   ;;  %s3637_s6 = inlined_call_operand.hbm [shape: f32[32,32], index: 6, kind: input, shape index: {}]   ;;  %s3638_s7 = inlined_call_operand.hbm [shape: f32[32,32], index: 7, kind: input, shape index: {}]   ;;  %s3639_s8 = inlined_call_operand.hbm [shape: f32[2,8,32], index: 8, kind: output, shape index: {0}]   ;;  %s3640_s9 = inlined_call_operand.hbm [shape: f32[2,4,8,8], index: 9, kind: output, shape index: {1}]  }
   0x1   :  { %3656 = sst [smem:[#allocation32_spill]] %s3632_s1 }
   0x2   :  { %3657 = sst [smem:[#allocation33_spill]] %s3634_s3 }
   0x3   :  { %3658 = sst [smem:[#allocation34_spill]] %s3635_s4 }
   0x4   :  { %3659 = sst [smem:[#allocation35_spill]] %s3636_s5 }
   0x5   :  { %15 = vsyncpa [#allocation3], 0 }
   0x6   :  { %17 = vsyncpa [#allocation3 + $0x1], 0 }
   0x7   :  { %18 = vsyncpa [#allocation6], 0 }
   0x8   :  { %20 = vsyncpa [#allocation6 + $0x1], 0 }
   0x9   :  { %21 = vsyncpa [#allocation9], 0 }
   0xa   :  { %22 = vsyncpa [#allocation12], 0 }
   0xb   :  { %23 = vsyncpa [#allocation15], 0 }
   0xc   :  { %24 = vsyncpa [#allocation4], 0 }
   0xd   :  { %26 = vsyncpa [#allocation4 + $0x1], 0 }
   0xe   :  { %27 = vsyncpa [#allocation18], 0 }
   0xf   :  { %29 = vsyncpa [#allocation18 + $0x1], 0  ;;  %s3156_s30 = smov 0   ;;  %s3158_s10 = smov 0  }
  0x10   :  { %s3160_s11 = smov 0   ;;  %s3162_s12 = smov 0  }
  0x11   :  { %s3164_s13 = smov 0   ;;  %s3166_s14 = smov 0  }
  0x12 LB: > { %3660 = sst [smem:[#allocation26_spill]] %s3063_s30  ;;  %s3187_s15 = sadd.s32 4294967295, %s3083_s14   ;;  %s3083_s14 = sphi %s3166_s14, %s35_s14   ;;  %s3079_s13 = sphi %s3164_s13, %s3699_s13   ;;  %s3075_s12 = sphi %s3162_s12, %s3698_s12   ;;  %s3071_s11 = sphi %s3160_s11, %s3702_s11   ;;  %s3067_s10 = sphi %s3158_s10, %s3701_s10   ;;  %s3063_s30 = sphi %s3156_s30, %s3700_s30  }
  0x13   : > { %3661 = sst [smem:[#allocation27_spill]] %s3079_s13  ;;  %p2399_p0 = scmp.ge.s32.totalorder %s3083_s14, 1 }
  0x14   : > { %3662 = sst [smem:[#allocation28_spill]] %s3083_s14  ;;  %p3641_p1 = scmp.eq.s32.totalorder %s3187_s15, 0 }
  0x15   : > { %p298_p2 = scmp.lt.s32.totalorder %s3083_s14, 3  ;;  %s3085_s17 = smov [#allocation8]  }
  0x16   : > { %s313_s18 = sshll.u32 %s3085_s17, 4  ;;  %s3086_s20 = smov [#allocation11]   ;;  %s314_s18 = int_to_ptr.vmem [resolvable:$true] %s313_s18 }
  0x17   : > { %p3192_p3 = pnand %p2399_p0, %p298_p2  ;;  %s336_s21 = sshll.u32 %s3086_s20, 4  ;;  %s337_s21 = int_to_ptr.vmem [resolvable:$true] %s336_s21 }
  0x18   : > { %s2754_s23 = scalar_lea.vmem %s314_s18, 128  ;;  %p2762_p11 = scmp.lt.s32.totalorder %s314_s18, %s314_s18 }
  0x19   : > { %s3663_s16 = scalar_select %p3192_p3, 1, 0 }
  0x1a   : > { %p2618_p5 = pneg %p3192_p3  ;;  %p2755_p8 = scmp.ne.s32.totalorder %s314_s18, %s2754_s23 }
  0x1b   : > { %p2763_p12 = scmp.lt.s32.totalorder %s2754_s23, %s2754_s23 }
  0x1c   : > { %p3201_p6 = pnand %p2618_p5, %p3641_p1 }
  0x1d   : > { %p2764_p13 = por %p2763_p12, %p2762_p11 }
  0x1e   : > { %p3207_p7 = pneg %p3201_p6 }
  0x20   : > { %p2757_p9 = pnand %p2755_p8, %p3207_p7 }
  0x22   : > { %p2758_p10 = pneg %p2757_p9 }
  0x24   : > { %p2765_p0 = pnand %p2764_p13, %p2758_p10 }
  0x26   : > { %2768 = shalt.err (!%p2765_p0)
}
  0x27   : > { %s3666_s3 = sld [smem:[#allocation33_spill]]  ;;  %s2780_s26 = scalar_lea.vmem %s337_s21, 512 }
  0x28   : > { %p2781_p2 = scmp.ne.s32.totalorder %s337_s21, %s2780_s26  ;;  %p2788_p1 = scmp.lt.s32.totalorder %s337_s21, %s337_s21 }
  0x29   : > { %p2789_p8 = scmp.lt.s32.totalorder %s2780_s26, %s2780_s26 }
  0x2a   : > { %p2783_p5 = pnand %p2781_p2, %p3207_p7 }
  0x2b   : > { %p2790_p9 = por %p2789_p8, %p2788_p1 }
  0x2c   : > { %p2784_p4 = pneg %p2783_p5 }
  0x2d   : > { %2621 = dma.hbm_to_vmem [thread:$0]  (!%p3201_p6), %s3666_s3, 128, %s314_s18, [#allocation9]  }
  0x2e   : > { %p2791_p3 = pnand %p2790_p9, %p2784_p4 }
  0x30   : > { %2794 = shalt.err (!%p2791_p3)
}
  0x31   : > { %s3643_s27 = smov 128   ;;  %s3645_s28 = smov 8  }
  0x32   : > { %s3667_s5 = sld [smem:[#allocation35_spill]]  ;;  %s2398_s18 = sadd.s32 4294967294, %s3083_s14  }
  0x33   : > { %s47_s20 = sadd.s32 1, %s3079_s13  ;;  %s56_s23 = sadd.s32 1, %s3071_s11 }
  0x34   : > { %p49_p1 = scmp.ge.s32.totalorder %s47_s20, 2  ;;  %p63_p3 = scmp.ne.s32.totalorder %s3071_s11, %s3067_s10 }
  0x35   : > { %p64_p4 = scmp.eq.s32.totalorder %s3083_s14, 0  ;;  %p69_p11 = scmp.ne.s32.totalorder %s3067_s10, %s3063_s30 }
  0x36   : > { %s3704_s20 = smov (%p49_p1, %s47_s20), 0  ;;  %p257_p12 = scmp.eq.s32.totalorder %s3187_s15, 1 }
  0x37   : > { %3668 = sst [smem:[#allocation29_spill]] %s3704_s20  ;;  %p3236_p10 = por %p64_p4, %p63_p3 }
  0x38   : > { %2627 = dma.hbm_to_vmem [thread:$0]  (!%p3201_p6), %s3667_s5, 512, %s337_s21, [#allocation12], %s3643_s27, %s3643_s27, %s3645_s28  }
  0x39   : > { %s51_s21 = ssub.s32 %s3079_s13, %s3704_s20  ;;  %p3670_p0 = scmp.eq.s32.totalorder %s3187_s15, 0 }
  0x3a   : > { %p54_p13 = scmp.eq.s32.totalorder %s51_s21, 0  ;;  %p3251_p5 = por %p257_p12, %p63_p3 }
  0x3b   : > { %p3247_p2 = por %p3670_p0, %p69_p11  ;;  %p263_p8 = scmp.eq.s32.totalorder %s2398_s18, 1 }
  0x3c   : > { %s3672_s26 = scalar_select %p3251_p5, 1, 0 }
  0x3d   : > { %s3256_s29 = scalar_select %p54_p13, %s3071_s11, %s56_s23  }
  0x3e   : > { %p3258_p9 = por %p263_p8, %p69_p11  ;;  %p2656_p1 = scmp.lt.s32.totalorder %s3083_s14, 2 }
  0x3f   : > { %3673 = sst [smem:[#allocation30_spill]] %s3256_s29  ;;  %s3650_s27 = sand.u32 1, %s3071_s11  }
  0x40   : > { %s3674_s17 = scalar_select %p3258_p9, 1, 0 }
  0x41   : > { %s3265_s28 = sshll.u32 %s3079_s13, 7  ;;  %s3269_s21 = sshll.u32 %s3650_s27, 3 }
  0x42   : > { %3675 = sst [smem:[#allocation31_spill]] %s3674_s17  ;;  %p3273_p3 = pnand %p2656_p1, %p3236_p10 }
  0x43   : > { %s395_s18 = sand.u32 1, %s3083_s14   ;;  %s3677_s1 = sld [smem:[#allocation32_spill]] }
  0x44   : > { %s399_s29 = scalar_lea.vmem [#allocation5], %s3269_s21  ;;  %s3283_s17 = scalar_lea.sflag [#allocation6], %s395_s18 }
  0x45   : > { %s406_s13 = sshll.u32 %s399_s29, 4  ;;  %p3654_p4 = pneg %p3273_p3  ;;  %s407_s13 = int_to_ptr.vmem [resolvable:$true] %s406_s13 }
  0x46   : > { %s2808_s24 = scalar_lea.vmem %s407_s13, 128  ;;  %s3089_s27 = smov [#allocation5]  }
  0x47   : > { %p2809_p11 = scmp.ne.s32.totalorder %s407_s13, %s2808_s24  ;;  %s2813_s30 = sshll.u32 %s3089_s27, 4  ;;  %s2814_s30 = int_to_ptr.vmem [resolvable:$false] %s2813_s30 }
  0x48   : > { %s2815_s14 = scalar_lea.vmem %s2814_s30, 256  ;;  %p2816_p13 = scmp.lt.s32.totalorder %s407_s13, %s2814_s30 }
  0x49   : > { %s404_s20 = scalar_lea.hbm %s3677_s1, %s3265_s28  ;;  %p2811_p10 = pnand %p2809_p11, %p3654_p4 }
  0x4a   : > { %p2817_p0 = scmp.lt.s32.totalorder %s2815_s14, %s2808_s24 }
  0x4b   : > { %p2812_p12 = pneg %p2811_p10 }
  0x4c   : > { %p2818_p8 = por %p2817_p0, %p2816_p13 }
  0x4e   : > { %p2819_p1 = pnand %p2818_p8, %p2812_p12 }
  0x50   : > { %2822 = shalt.err (!%p2819_p1)
}
  0x51   : > { %2640 = dma.hbm_to_vmem [thread:$0]  (!%p3273_p3), %s404_s20, 128, %s407_s13, %s3283_s17  }
  0x52   : > { %s3090_s5 = smov [#allocation10]   ;;  %s3091_s18 = smov [#allocation13]  }
  0x53   : > { %s323_s29 = sshll.u32 %s3090_s5, 4  ;;  %s349_s23 = sshll.u32 %s3091_s18, 4  ;;  %s324_s29 = int_to_ptr.vmem [resolvable:$true] %s323_s29  ;;  %s350_s23 = int_to_ptr.vmem [resolvable:$true] %s349_s23 }
  0x54   : > { %s2834_s1 = scalar_lea.vmem %s324_s29, 512  ;;  %p2842_p9 = scmp.lt.s32.totalorder %s324_s29, %s324_s29 }
  0x55   : > { %p2835_p11 = scmp.ne.s32.totalorder %s324_s29, %s2834_s1  ;;  %p2843_p5 = scmp.lt.s32.totalorder %s2834_s1, %s2834_s1 }
  0x57   : > { %p2837_p10 = pnand %p2835_p11, %p3207_p7  ;;  %p2844_p13 = por %p2843_p5, %p2842_p9 }
  0x59   : > { %p2838_p4 = pneg %p2837_p10 }
  0x5b   : > { %p2845_p12 = pnand %p2844_p13, %p2838_p4 }
  0x5d   : > { %2848 = shalt.err (!%p2845_p12)
}
  0x5e   : > { %s3678_s30 = smov 8   ;;  %s3679_s14 = smov 128  }
  0x5f   : > { %s3680_s4 = sld [smem:[#allocation34_spill]]  ;;  %s2860_s20 = scalar_lea.vmem %s350_s23, 512 }
  0x60   : > { %p2861_p0 = scmp.ne.s32.totalorder %s350_s23, %s2860_s20  ;;  %p2868_p11 = scmp.lt.s32.totalorder %s350_s23, %s350_s23 }
  0x61   : > { %p2869_p5 = scmp.lt.s32.totalorder %s2860_s20, %s2860_s20 }
  0x62   : > { %p2863_p8 = pnand %p2861_p0, %p3207_p7 }
  0x63   : > { %p2870_p9 = por %p2869_p5, %p2868_p11 }
  0x64   : > { %p2864_p1 = pneg %p2863_p8 }
  0x65   : > { %2624 = dma.hbm_to_vmem [thread:$0]  (!%p3201_p6), %s3680_s4, 512, %s324_s29, [#allocation9], %s3679_s14, %s3679_s14, %s3678_s30  }
  0x66   : > { %p2871_p4 = pnand %p2870_p9, %p2864_p1 }
  0x68   : > { %2874 = shalt.err (!%p2871_p4)
}
  0x69   : > { %2630 = dma.hbm_to_vmem [thread:$0]  (!%p3201_p6), %s3637_s6, 512, %s350_s23, [#allocation12], %s3679_s14, %s3679_s14, %s3678_s30  }
  0x6a   : > { %s3092_s5 = smov [#allocation14]  }
  0x6b   : > { %s362_s29 = sshll.u32 %s3092_s5, 4  ;;  %s363_s29 = int_to_ptr.vmem [resolvable:$true] %s362_s29 }
  0x6c   : > { %s2886_s18 = scalar_lea.vmem %s363_s29, 512  ;;  %p2894_p0 = scmp.lt.s32.totalorder %s363_s29, %s363_s29 }
  0x6d   : > { %p2887_p10 = scmp.ne.s32.totalorder %s363_s29, %s2886_s18  ;;  %p2895_p8 = scmp.lt.s32.totalorder %s2886_s18, %s2886_s18 }
  0x6f   : > { %p2889_p13 = pnand %p2887_p10, %p3207_p7  ;;  %p2896_p1 = por %p2895_p8, %p2894_p0 }
  0x71   : > { %p2890_p12 = pneg %p2889_p13 }
  0x73   : > { %p2897_p11 = pnand %p2896_p1, %p2890_p12 }
  0x75   : > { %2900 = shalt.err (!%p2897_p11)
}
  0x76   : > { %2633 = dma.hbm_to_vmem [thread:$0]  (!%p3201_p6), %s3638_s7, 512, %s363_s29, [#allocation15], %s3679_s14, %s3679_s14, %s3678_s30  }
  0x77   : > { %s386_s20 = scalar_lea.hbm %s3631_s0, %s3265_s28  ;;  %s380_s1 = scalar_lea.vmem [#allocation2], %s3269_s21 }
  0x78   : > { %s388_s24 = sshll.u32 %s380_s1, 4  ;;  %s3681_s5 = sand.u32 1, %s3071_s11   ;;  %s389_s24 = int_to_ptr.vmem [resolvable:$true] %s388_s24 }
  0x79   : > { %s377_s19 = scalar_lea.sflag [#allocation3], %s3681_s5  ;;  %s2914_s18 = scalar_lea.vmem %s389_s24, 128 }
  0x7a   : > { %p2915_p7 = scmp.ne.s32.totalorder %s389_s24, %s2914_s18  ;;  %p3682_p5 = pneg %p3273_p3 }
  0x7b   : > { %s3093_s13 = smov [#allocation2]  }
  0x7c   : > { %p2917_p9 = pnand %p2915_p7, %p3682_p5  ;;  %s2919_s23 = sshll.u32 %s3093_s13, 4  ;;  %s2920_s23 = int_to_ptr.vmem [resolvable:$false] %s2919_s23 }
  0x7d   : > { %s2921_s4 = scalar_lea.vmem %s2920_s23, 256  ;;  %p2922_p6 = scmp.lt.s32.totalorder %s389_s24, %s2920_s23 }
  0x7e   : > { %p2918_p4 = pneg %p2917_p9  ;;  %p2923_p10 = scmp.lt.s32.totalorder %s2921_s4, %s2914_s18 }
  0x80   : > { %p2924_p13 = por %p2923_p10, %p2922_p6 }
  0x82   : > { %p2925_p12 = pnand %p2924_p13, %p2918_p4 }
  0x84   : > { %2928 = shalt.err (!%p2925_p12)
}
  0x85   : > { %2637 = dma.hbm_to_vmem [thread:$0]  (!%p3273_p3), %s386_s20, 128, %s389_s24, %s377_s19  }
  0x86   : > { %s422_s29 = scalar_lea.hbm %s3633_s2, %s3265_s28  ;;  %s417_s22 = scalar_lea.vmem [#allocation7], %s3269_s21 }
  0x87   : > { %s424_s27 = sshll.u32 %s417_s22, 4  ;;  %p3683_p8 = pmov %p3682_p5  ;;  %s425_s27 = int_to_ptr.vmem [resolvable:$true] %s424_s27 }
  0x88   : > { %s2942_s1 = scalar_lea.vmem %s425_s27, 128  ;;  %s3094_s4 = smov [#allocation7]  }
  0x89   : > { %p2943_p0 = scmp.ne.s32.totalorder %s425_s27, %s2942_s1  ;;  %s2947_s5 = sshll.u32 %s3094_s4, 4  ;;  %s2948_s5 = int_to_ptr.vmem [resolvable:$false] %s2947_s5 }
  0x8a   : > { %s2949_s18 = scalar_lea.vmem %s2948_s5, 256  ;;  %p2950_p7 = scmp.lt.s32.totalorder %s425_s27, %s2948_s5 }
  0x8b   : > { %p2945_p1 = pnand %p2943_p0, %p3683_p8  ;;  %p2951_p5 = scmp.lt.s32.totalorder %s2949_s18, %s2942_s1 }
  0x8d   : > { %p2946_p11 = pneg %p2945_p1  ;;  %p2952_p9 = por %p2951_p5, %p2950_p7 }
  0x8f   : > { %p2953_p4 = pnand %p2952_p9, %p2946_p11 }
  0x91   : > { %2956 = shalt.err (!%p2953_p4)
}
  0x92   : > { %2643 = dma.hbm_to_vmem [thread:$0]  (!%p3273_p3), %s422_s29, 128, %s425_s27, %s3283_s17  }
  0x93   : > { %p3684_p6 = scmp.ne.s32.totalorder %s3663_s16, 0 }
  0x94   : > { %s3349_s28 = sand.u32 (!%p3684_p6), 1, %s3067_s10  }
  0x95   : > { %433 = sbr.rel (%p3684_p6) target bundleno = 1442 (0x5a2), region = 52  ;;  %s3352_s21 = sshll.u32 (!%p3684_p6), %s3349_s28, 3 }
  0x96   : > { %s436_s20 = scalar_lea.sflag (!%p3684_p6), [#allocation3], %s3349_s28  ;;  %s439_s24 = scalar_lea.vmem (!%p3684_p6), [#allocation2], %s3352_s21 }
  0x9a   : > { %3034 = dma.done.wait (%p3247_p2), %s436_s20, 128  }
  0x9b   : > { %3036 = vsyncadd (%p3247_p2), %s436_s20, 4294967168  ;;  %s444_s3 = sand.u32 1, %s3187_s15   ;;  %s448_s17 = scalar_lea.vmem [#allocation5], %s3352_s21 }
  0x9c   : > { %s445_s16 = scalar_lea.sflag [#allocation6], %s444_s3 }
  0x9d   : > { %3038 = dma.done.wait (%p3247_p2), %s445_s16, 256  }
  0x9e   : > { %3040 = vsyncadd (%p3247_p2), %s445_s16, 4294967040  ;;  %s457_s19 = scalar_lea.vmem [#allocation7], %s3352_s21  ;;  %p3685_p3 = scmp.eq.s32.totalorder %s3187_s15, 0 }
  0xa0   : > { %3042 = dma.done.wait (%p3685_p3), [#allocation9], 640   ;;  %p3686_p10 = pmov %p3685_p3 }
  0xa1   : > { %p3687_p13 = pmov %p3685_p3 }
  0xa2   : > { %3044 = vsyncadd (%p3686_p10), [#allocation9], 4294966656 }
  0xa3   : > { %3046 = dma.done.wait (%p3687_p13), [#allocation12], 1024   ;;  %p3688_p12 = pmov %p3685_p3 }
  0xa4   : > { %p3689_p0 = pmov %p3685_p3 }
  0xa5   : > { %3048 = vsyncadd (%p3688_p12), [#allocation12], 4294966272 }
  0xa6   : > { %3050 = dma.done.wait (%p3689_p0), [#allocation15], 512   ;;  %p3690_p8 = pmov %p3689_p0 }
  0xa7   : > { %v3095_v0 = vmov 0.0   ;;  %vm3096_vm0 = vmmov 0   ;;  %v536_v1 = vld [vmem:[#allocation10 + $0x18] sm:$0xff]  ;;  %v535_v3 = vld [vmem:[#allocation10 + $0x10] sm:$0xff]  ;;  %v534_v5 = vld [vmem:[#allocation10 + $0x8] sm:$0xff]  ;;  %vm537_vm1 = vcmask 261120   ;;  %v781_v23 = vlaneseq }
  0xa8   : > { %3052 = vsyncadd (%p3690_p8), [#allocation15], 4294966784  ;;  %2495 = vmatprep.subr.mxu0 %v3095_v0  ;;  %2506 = vmatprep.subr.mxu1 %v3095_v0  ;;  %v615_v2 = vld [vmem:[#allocation11 + $0x18] sm:$0xff]  ;;  %v614_v4 = vld [vmem:[#allocation11 + $0x10] sm:$0xff]  ;;  %s3097_s15 = smov 104   ;;  %s3098_s25 = smov 120  }
  0xa9   : > { %2503 = vmatprep.mubr.msk.f32.mxu0 %vm3096_vm0, %v3095_v0  ;;  %2514 = vmatprep.mubr.msk.f32.mxu1 %vm3096_vm0, %v3095_v0  ;;  %v613_v6 = vld [vmem:[#allocation11 + $0x8] sm:$0xff]  ;;  %v533_v7 = vld [vmem:[#allocation10] sm:$0xff]  ;;  %v692_v16 = vld [vmem:[#allocation13 + $0x18] sm:$0xff]  ;;  %s3099_s13 = smov 112   ;;  %v3100_v21 = vmov 1983009808  }
  0xaa   : > { %2496 = vmatpush3.msra.mxu0 %v536_v1  ;;  %2507 = vmatpush3.msra.mxu1 %v615_v2  ;;  %v612_v8 = vld [vmem:[#allocation11] sm:$0xff]  ;;  %v527_v9 = vld [vmem:[%s439_s24] sm:$0xff]  ;;  %v779_v22 = vunpack.c.l.s4 %v3100_v21  ;;  %v3101_v24 = vmov 1934713408   ;;  %v782_v27 = vshrl.u32 %v781_v23, 7  ;;  %vm1204_vm2 = vcmask 64512  }
  0xab   : > { %2497 = vmatprep.subr.mxu0 %v3095_v0  ;;  %2508 = vmatprep.subr.mxu1 %v3095_v0  ;;  %v528_v10 = vld [vmem:[%s448_s17] sm:$0xff]  ;;  %v691_v17 = vld [vmem:[#allocation13 + $0x10] sm:$0xff]  ;;  %v690_v18 = vld [vmem:[#allocation13 + $0x8] sm:$0xff]  ;;  %v811_v25 = vunpack.c.l.s4 %v3101_v24  ;;  %s2422_s23 = sshll.u32 %s3349_s28, 5  ;;  %s2455_s14 = sshll.u32 %s3075_s12, 9 }
  0xac   : > { %2498 = vmatpush3.msra.mxu0 %v535_v3  ;;  %2509 = vmatpush3.msra.mxu1 %v614_v4  ;;  %v689_v19 = vld [vmem:[#allocation13] sm:$0xff]  ;;  %v529_v20 = vld [vmem:[%s457_s19] sm:$0xff]  ;;  %v780_v26 = vunpack.c.0.s8 %v779_v22  ;;  %s3505_s30 = scalar_lea.vmem [#allocation17], %s2422_s23  ;;  %s3558_s1 = scalar_lea.hbm %s3640_s9, %s2455_s14 }
  0xad   : > { %2499 = vmatprep.subr.mxu0 %v3095_v0  ;;  %2510 = vmatprep.subr.mxu1 %v3095_v0  ;;  %v812_v30 = vunpack.c.0.s8 %v811_v25  ;;  %s2187_s29 = sshll.u32 %s3505_s30, 4  ;;  %s2159_s4 = scalar_lea.sflag [#allocation18], %s3349_s28  ;;  %s3560_s29 = int_to_ptr.vmem [resolvable:$true] %s2187_s29 }
  0xae   : > { %2500 = vmatpush3.msra.mxu0 %v534_v5  ;;  %2511 = vmatpush3.msra.mxu1 %v613_v6  ;;  %v3423_v31 = vsub.s32 %v780_v26, %v782_v27  ;;  %s2957_s5 = scalar_lea.vmem %s3560_s29, 512  ;;  %p3691_p1 = scmp.ne.s32.totalorder %s3672_s26, 0 }
  0xaf   : > { %2501 = vmatprep.subr.mxu0 %v3095_v0  ;;  %2512 = vmatprep.subr.mxu1 %v3095_v0  ;;  %v3425_v38 = vsub.s32 %v812_v30, %v782_v27  ;;  %p2958_p2 = scmp.ne.s32.totalorder %s3560_s29, %s2957_s5  ;;  %s3102_s18 = smov [#allocation17]  }
  0xb0   : > { %2502 = vmatpush3.msra.mxu0 %v533_v7  ;;  %2513 = vmatpush3.msra.mxu1 %v612_v8  ;;  %s2961_s20 = sshll.u32 %s3102_s18, 4  ;;  %s2962_s20 = int_to_ptr.vmem [resolvable:$false] %s2961_s20 }
  0xb1   : > { %2504 = vmatmul.mubr.msk.f32.vlgmr.msra.gmra.mxu0 %vm537_vm1, %v527_v9  ;;  %2515 = vmatmul.mubr.msk.f32.vlgmr.msra.gmra.mxu1 %vm537_vm1, %v528_v10  ;;  %p2959_p11 = pnand %p2958_p2, %p3691_p1  ;;  %s2963_s24 = scalar_lea.vmem %s2962_s20, 1024 }
  0xb2   : > { %2517 = vmatprep.subr.mxu0 %v3095_v0  ;;  %2525 = vmatprep.mubr.msk.f32.mxu0 %vm3096_vm0, %v3095_v0  ;;  %p2964_p5 = scmp.lt.s32.totalorder %s3560_s29, %s2962_s20  ;;  %p2965_p9 = scmp.lt.s32.totalorder %s2963_s24, %s2957_s5 }
  0xb3   : > { %2528 = vmatprep.subr.mxu1 %v3095_v0  ;;  %2530 = vmatprep.mubr.msk.f32.mxu1 %vm3096_vm0, %v3095_v0  ;;  %p2960_p7 = pneg %p2959_p11 }
  0xb4   : > { %2518 = vmatpush3.msra.mxu0 %v692_v16  ;;  %p2966_p4 = por %p2965_p9, %p2964_p5 }
  0xb5   : > { %2519 = vmatprep.subr.mxu0 %v3095_v0 }
  0xb6   : > { %2520 = vmatpush3.msra.mxu0 %v691_v17  ;;  %p2967_p6 = pnand %p2966_p4, %p2960_p7 }
  0xb7   : > { %2521 = vmatprep.subr.mxu0 %v3095_v0 }
  0xb8   : > { %2522 = vmatpush3.msra.mxu0 %v690_v18 }
  0xb9   : > { %2523 = vmatprep.subr.mxu0 %v3095_v0 }
  0xba   : > { %2524 = vmatpush3.msra.mxu0 %v689_v19 }
  0xbb   : > { %2538 = vmatprep.subr.mxu0 %v3095_v0  ;;  %2526 = vmatmul.mubr.msk.f32.vlgmr.msra.gmra.mxu0 %vm537_vm1, %v529_v20 }
  0xbc   : > { %2540 = vmatprep.mubr.msk.f32.mxu0 %vm3096_vm0, %v3095_v0 }
 0x171   : > { %v607_v11 = vpop.f32.mrf.mxu0  ;;  %v685_v12 = vpop.f32.mrf.mxu1 }
 0x172   : > { %v3403_v13 = vmul.f32 0.35355338, %v607_v11  ;;  %919 = vrot.lane.b32.xlu1 %v685_v12, %s3097_s15  ;;  %913 = vrot.lane.b32.xlu0 %v685_v12, %s3098_s25 }
 0x173   : > { %v2505_v14 = vpop.f32.mrf.mxu0  ;;  %v2516_v15 = vpop.f32.mrf.mxu1 }
 0x176   : > { %916 = vrot.lane.b32.xlu0 %v685_v12, %s3099_s13  ;;  %767 = vrot.lane.b32.xlu1 %v3403_v13, %s3098_s25 }
 0x17a   : > { %770 = vrot.lane.b32.xlu0 %v3403_v13, %s3099_s13  ;;  %773 = vrot.lane.b32.xlu1 %v3403_v13, %s3097_s15 }
 0x1e4   : > { %v920_v28 = vpop.permute.xlu1 %919  ;;  %v914_v29 = vpop.permute.xlu0 %913 }
 0x1e5   : > { %v938_v32 = vcombine.low %v914_v29, %v920_v28  ;;  %v939_v33 = vcombine.high %v914_v29, %v920_v28 }
 0x1e7   : > { %v946_v39 = vrot.slane %v938_v32, %v3423_v31  ;;  %v953_v40 = vrot.slane %v939_v33, %v3423_v31 }
 0x1e8   : > { %v917_v34 = vpop.permute.xlu0 %916  ;;  %v768_v35 = vpop.permute.xlu1 %767 }
 0x1e9   : > { %v922_v36 = vcombine.low %v685_v12, %v917_v34  ;;  %v923_v37 = vcombine.high %v685_v12, %v917_v34 }
 0x1eb   : > { %v930_v41 = vrot.slane %v922_v36, %v3423_v31  ;;  %v937_v42 = vrot.slane %v923_v37, %v3423_v31 }
 0x1ec   : > { %v771_v43 = vpop.permute.xlu0 %770  ;;  %v774_v44 = vpop.permute.xlu1 %773 }
 0x1ed   : > { %v954_v45 = vcombine.low %v930_v41, %v946_v39  ;;  %v955_v46 = vcombine.high %v930_v41, %v946_v39  ;;  %v970_v47 = vcombine.low %v937_v42, %v953_v40  ;;  %v971_v48 = vcombine.high %v937_v42, %v953_v40 }
 0x1ee   : > { %v776_v49 = vcombine.low %v3403_v13, %v771_v43  ;;  %v777_v50 = vcombine.high %v3403_v13, %v771_v43  ;;  %v792_v51 = vcombine.low %v768_v35, %v774_v44  ;;  %v793_v52 = vcombine.high %v768_v35, %v774_v44 }
 0x1ef   : > { %v962_v53 = vrot.slane %v954_v45, %v3425_v38  ;;  %v969_v54 = vrot.slane %v955_v46, %v3425_v38  ;;  %v978_v55 = vrot.slane %v970_v47, %v3425_v38  ;;  %v985_v56 = vrot.slane %v971_v48, %v3425_v38  ;;  %v3481_v48 = vpop.f32.mrf.mxu0 }
 0x1f0   : > { %v784_v57 = vrot.slane %v776_v49, %v3423_v31  ;;  %v791_v58 = vrot.slane %v777_v50, %v3423_v31  ;;  %v800_v59 = vrot.slane %v792_v51, %v3423_v31  ;;  %v807_v60 = vrot.slane %v793_v52, %v3423_v31  ;;  %v530_v50 = vld [vmem:[#allocation8] sm:$0xff] }
 0x1f1   : > { %v990_v61 = vcombine.low %v962_v53, %v969_v54  ;;  %v2428_v62 = vcombine.high %v962_v53, %v969_v54  ;;  %v1006_v63 = vcombine.low %v978_v55, %v985_v56  ;;  %v2429_v1 = vcombine.high %v978_v55, %v985_v56  ;;  %v2527_v49 = vpop.f32.mrf.mxu0 }
 0x1f2   : > { %v808_v2 = vcombine.low %v784_v57, %v800_v59  ;;  %v809_v3 = vcombine.high %v784_v57, %v800_v59  ;;  %v824_v4 = vcombine.low %v791_v58, %v807_v60  ;;  %v825_v5 = vcombine.high %v791_v58, %v807_v60 }
 0x1f3   : > { %v997_v6 = vrot.slane %v990_v61, %v3423_v31  ;;  %v1005_v7 = vrot.slane %v2428_v62, %v3423_v31  ;;  %v1013_v8 = vrot.slane %v1006_v63, %v3423_v31  ;;  %v1021_v9 = vrot.slane %v2429_v1, %v3423_v31 }
 0x1f4   : > { %v816_v10 = vrot.slane %v808_v2, %v3425_v38  ;;  %v823_v11 = vrot.slane %v809_v3, %v3425_v38  ;;  %v832_v12 = vrot.slane %v824_v4, %v3425_v38  ;;  %v839_v13 = vrot.slane %v825_v5, %v3425_v38 }
 0x1f5   : > { %v1022_v14 = vcombine.low %v997_v6, %v1005_v7  ;;  %v1023_v15 = vcombine.high %v997_v6, %v1005_v7  ;;  %v1038_v16 = vcombine.low %v1013_v8, %v1021_v9  ;;  %v1039_v17 = vcombine.high %v1013_v8, %v1021_v9 }
 0x1f6   : > { %v844_v18 = vcombine.low %v816_v10, %v823_v11  ;;  %v2426_v19 = vcombine.high %v816_v10, %v823_v11  ;;  %v860_v20 = vcombine.low %v832_v12, %v839_v13  ;;  %v2427_v21 = vcombine.high %v832_v12, %v839_v13 }
 0x1f7   : > { %v1030_v22 = vrot.slane %v1022_v14, %v3425_v38  ;;  %v1046_v23 = vrot.slane %v1038_v16, %v3425_v38  ;;  %v1037_v24 = vrot.slane %v1023_v15, %v3425_v38  ;;  %v1053_v25 = vrot.slane %v1039_v17, %v3425_v38 }
 0x1f8   : > { %v851_v26 = vrot.slane %v844_v18, %v3423_v31  ;;  %v859_v27 = vrot.slane %v2426_v19, %v3423_v31  ;;  %v867_v28 = vrot.slane %v860_v20, %v3423_v31  ;;  %v875_v29 = vrot.slane %v2427_v21, %v3423_v31 }
 0x1f9   : > { %v1054_v30 = vcombine.low %v1030_v22, %v1046_v23  ;;  %v1056_v32 = vcombine.low %v1037_v24, %v1053_v25  ;;  %v1055_v44 = vcombine.high %v1030_v22, %v1046_v23  ;;  %v1057_v46 = vcombine.high %v1037_v24, %v1053_v25 }
 0x1fa   : > { %v876_v33 = vcombine.low %v851_v26, %v859_v27  ;;  %v877_v34 = vcombine.high %v851_v26, %v859_v27  ;;  %v892_v35 = vcombine.low %v867_v28, %v875_v29  ;;  %v893_v36 = vcombine.high %v867_v28, %v875_v29 }
 0x1fb   : > { %2529 = vmatpush3.xpose.msk.msra.mxu1 %vm1204_vm2, %v1054_v30  ;;  %2539 = vmatpush3.xpose.msk.msra.mxu0 %vm1204_vm2, %v1056_v32  ;;  %vm531_vm3 = vcmp.eq.s32.totalorder %v530_v50, 1 }
 0x1fc   : > { %2533 = vmatprep.subr.mxu1 %v3095_v0  ;;  %v884_v37 = vrot.slane %v876_v33, %v3425_v38  ;;  %v900_v39 = vrot.slane %v892_v35, %v3425_v38  ;;  %v891_v40 = vrot.slane %v877_v34, %v3425_v38  ;;  %v907_v41 = vrot.slane %v893_v36, %v3425_v38 }
 0x1fd   : > { %2548 = vmatprep.subr.mxu0 %v3095_v0  ;;  %v532_v51 = vsel %vm531_vm3, -1e+09, %v3095_v0 }
 0x1fe   : > { %v908_v42 = vcombine.low %v884_v37, %v900_v39  ;;  %v910_v43 = vcombine.low %v891_v40, %v907_v41  ;;  %v909_v45 = vcombine.high %v884_v37, %v900_v39  ;;  %v911_v47 = vcombine.high %v891_v40, %v907_v41 }
 0x200   : > { %2531 = vmatmul.mubr.msk.f32.vlgmr.msra.gmra.mxu1 %vm1204_vm2, %v908_v42  ;;  %2541 = vmatmul.mubr.msk.f32.vlgmr.msra.gmra.mxu0 %vm1204_vm2, %v910_v43 }
 0x201   : > { %2534 = vmatpush3.xpose.msk.msra.mxu1 %vm1204_vm2, %v1055_v44  ;;  %2535 = vmatprep.mubr.msk.f32.mxu1 %vm3096_vm0, %v3095_v0 }
 0x202   : > { %2543 = vmatprep.subr.mxu1 %v3095_v0  ;;  %2550 = vmatprep.mubr.msk.f32.mxu0 %vm3096_vm0, %v3095_v0 }
 0x204   : > { %2536 = vmatmul.mubr.msk.f32.vlgmr.msra.gmra.mxu1 %vm1204_vm2, %v909_v45 }
 0x205   : > { %2544 = vmatpush3.xpose.msk.msra.mxu1 %vm1204_vm2, %v1057_v46  ;;  %2545 = vmatprep.mubr.msk.f32.mxu1 %vm3096_vm0, %v3095_v0 }
 0x206   : > { %2553 = vmatprep.subr.mxu1 %v3095_v0 }
 0x208   : > { %2546 = vmatmul.mubr.msk.f32.vlgmr.msra.gmra.mxu1 %vm1204_vm2, %v911_v47 }
 0x209   : > { %2555 = vmatprep.mubr.msk.f32.mxu1 %vm3096_vm0, %v3095_v0 }
 0x2c0   : > { %v1277_v52 = vpop.f32.mrf.mxu1  ;;  %v1429_v53 = vpop.f32.mrf.mxu0 }
 0x2c1   : > { %v1278_v54 = vadd.f32 %v1277_v52, %v532_v51  ;;  %v1430_v57 = vadd.f32 %v1429_v53, %v532_v51 }
 0x2c2   : > { %v2532_v55 = vpop.f32.mrf.mxu1  ;;  %v2542_v56 = vpop.f32.mrf.mxu0 }
 0x2c3   : > { %v1509_v58 = vsel %vm1204_vm2, %v1278_v54, -inf  ;;  %v1515_v63 = vsel %vm1204_vm2, %v1430_v57, -inf }
 0x2c4   : > { %1510 = vmax.xlane.f32.xlu0 %v1509_v58  ;;  %v1353_v59 = vpop.f32.mrf.mxu1 }
 0x2c5   : > { %v1354_v60 = vadd.f32 %v1353_v59, %v532_v51 }
 0x2c6   : > { %v2537_v61 = vpop.f32.mrf.mxu1 }
 0x2c7   : > { %v1512_v62 = vsel %vm1204_vm2, %v1354_v60, -inf }
 0x2c8   : > { %1513 = vmax.xlane.f32.xlu1 %v1512_v62  ;;  %v1505_v1 = vpop.f32.mrf.mxu1  ;;  %1516 = vmax.xlane.f32.xlu0 %v1515_v63 }
 0x2c9   : > { %v1506_v2 = vadd.f32 %v1505_v1, %v532_v51 }
 0x2ca   : > { %v2547_v3 = vpop.f32.mrf.mxu1 }
 0x2cb   : > { %v1518_v4 = vsel %vm1204_vm2, %v1506_v2, -inf }
 0x2cc   : > { %1519 = vmax.xlane.f32.xlu0 %v1518_v4 }
 0x2d9   : > { %1059 = vrot.lane.b32.xlu1 %v3481_v48, %s3098_s25 }
 0x34d   : > { %v1511_v5 = vpop.xlane.xlu0 %1510 }
 0x34e   : > { %v1521_v6 = vsub.f32 %v1278_v54, %v1511_v5 }
 0x350   : > { %v1525_v7 = vmul.f32 1.442695, %v1521_v6 }
 0x351   : > { %v1514_v8 = vpop.xlane.xlu1 %1513  ;;  %v1517_v9 = vpop.xlane.xlu0 %1516 }
 0x352   : > { %2727 = vpow2.f32 %v1525_v7  ;;  %v1522_v10 = vsub.f32 %v1354_v60, %v1514_v8  ;;  %v1523_v11 = vsub.f32 %v1430_v57, %v1517_v9 }
 0x354   : > { %v1527_v12 = vmul.f32 1.442695, %v1522_v10  ;;  %v1529_v13 = vmul.f32 1.442695, %v1523_v11 }
 0x355   : > { %v1520_v14 = vpop.xlane.xlu0 %1519  ;;  %v1060_v25 = vpop.permute.xlu1 %1059 }
 0x356   : > { %2729 = vpow2.f32 %v1527_v12  ;;  %v1524_v15 = vsub.f32 %v1506_v2, %v1520_v14  ;;  %v1850_v14 = vld [vmem:[#allocation14 + $0x8] sm:$0xff] }
 0x357   : > { %2731 = vpow2.f32 %v1529_v13 }
 0x358   : > { %v1531_v16 = vmul.f32 1.442695, %v1524_v15  ;;  %v1851_v15 = vld [vmem:[#allocation14 + $0x10] sm:$0xff] }
 0x35a   : > { %2733 = vpow2.f32 %v1531_v16 }
 0x35f   : > { %v2728_v17 = vpop.eup %2727 }
 0x360   : > { %v1533_v18 = vsel %vm1204_vm2, %v2728_v17, 0.0 }
 0x361   : > { %1534 = vadd.xlane.f32.xlu1 %v1533_v18  ;;  %v1852_v18 = vld [vmem:[#allocation14 + $0x18] sm:$0xff] }
 0x363   : > { %v2730_v19 = vpop.eup %2729 }
 0x364   : > { %v2732_v20 = vpop.eup %2731  ;;  %v1536_v21 = vsel %vm1204_vm2, %v2730_v19, 0.0 }
 0x365   : > { %1537 = vadd.xlane.f32.xlu0 %v1536_v21  ;;  %v1539_v22 = vsel %vm1204_vm2, %v2732_v20, 0.0 }
 0x366   : > { %1540 = vadd.xlane.f32.xlu1 %v1539_v22 }
 0x367   : > { %v2734_v23 = vpop.eup %2733 }
 0x368   : > { %v1542_v24 = vsel %vm1204_vm2, %v2734_v23, 0.0 }
 0x369   : > { %1543 = vadd.xlane.f32.xlu0 %v1542_v24 }
 0x377   : > { %1065 = vrot.lane.b32.xlu1 %v3481_v48, %s3097_s15 }
 0x37f   : > { %1062 = vrot.lane.b32.xlu0 %v3481_v48, %s3099_s13 }
 0x3ea   : > { %v1535_v26 = vpop.xlane.xlu1 %1534 }
 0x3eb   : > { %2735 = vrcp.f32 %v1535_v26 }
 0x3ee   : > { %v1538_v27 = vpop.xlane.xlu0 %1537 }
 0x3ef   : > { %v1541_v28 = vpop.xlane.xlu1 %1540  ;;  %2737 = vrcp.f32 %v1538_v27 }
 0x3f0   : > { %2739 = vrcp.f32 %v1541_v28 }
 0x3f2   : > { %v1544_v29 = vpop.xlane.xlu0 %1543 }
 0x3f3   : > { %v1066_v30 = vpop.permute.xlu1 %1065  ;;  %2741 = vrcp.f32 %v1544_v29 }
 0x3f4   : > { %v1084_v32 = vcombine.low %v1060_v25, %v1066_v30  ;;  %v1085_v33 = vcombine.high %v1060_v25, %v1066_v30 }
 0x3f6   : > { %v1063_v34 = vpop.permute.xlu0 %1062  ;;  %v1092_v39 = vrot.slane %v1084_v32, %v3423_v31  ;;  %v1099_v40 = vrot.slane %v1085_v33, %v3423_v31 }
 0x3f7   : > { %v1068_v35 = vcombine.low %v3481_v48, %v1063_v34  ;;  %v1069_v36 = vcombine.high %v3481_v48, %v1063_v34 }
 0x3f8   : > { %v2736_v37 = vpop.eup %2735 }
 0x3f9   : > { %v1076_v41 = vrot.slane %v1068_v35, %v3423_v31  ;;  %v1083_v42 = vrot.slane %v1069_v36, %v3423_v31  ;;  %v1549_v43 = vmul.f32 %v2736_v37, %v2728_v17 }
 0x3fb   : > { %v1100_v44 = vcombine.low %v1076_v41, %v1092_v39  ;;  %v1101_v45 = vcombine.high %v1076_v41, %v1092_v39  ;;  %v1116_v46 = vcombine.low %v1083_v42, %v1099_v40  ;;  %v1117_v47 = vcombine.high %v1083_v42, %v1099_v40  ;;  %1553 = vst.msk [vmem:[%s3505_s30] sm:$0xff] %vm1204_vm2, %v1549_v43 }
 0x3fc   : > { %v2738_v48 = vpop.eup %2737 }
 0x3fd   : > { %v2740_v49 = vpop.eup %2739  ;;  %v1108_v50 = vrot.slane %v1100_v44, %v3425_v38  ;;  %v1115_v51 = vrot.slane %v1101_v45, %v3425_v38  ;;  %v1124_v52 = vrot.slane %v1116_v46, %v3425_v38  ;;  %v1131_v53 = vrot.slane %v1117_v47, %v3425_v38 }
 0x3fe   : > { %v1550_v54 = vmul.f32 %v2738_v48, %v2730_v19  ;;  %v1551_v55 = vmul.f32 %v2740_v49, %v2732_v20 }
 0x3ff   : > { %v1136_v56 = vcombine.low %v1108_v50, %v1115_v51  ;;  %v2430_v57 = vcombine.high %v1108_v50, %v1115_v51  ;;  %v1152_v58 = vcombine.low %v1124_v52, %v1131_v53  ;;  %v2431_v59 = vcombine.high %v1124_v52, %v1131_v53 }
 0x400   : > { %v2742_v60 = vpop.eup %2741  ;;  %1554 = vst.msk [vmem:[%s3505_s30 + $0x8] sm:$0xff] %vm1204_vm2, %v1550_v54  ;;  %1555 = vst.msk [vmem:[%s3505_s30 + $0x10] sm:$0xff] %vm1204_vm2, %v1551_v55 }
 0x401   : > { %v1143_v61 = vrot.slane %v1136_v56, %v3423_v31  ;;  %v1151_v62 = vrot.slane %v2430_v57, %v3423_v31  ;;  %v1159_v63 = vrot.slane %v1152_v58, %v3423_v31  ;;  %v1167_v1 = vrot.slane %v2431_v59, %v3423_v31 }
 0x402   : > { %v1552_v2 = vmul.f32 %v2742_v60, %v2734_v23 }
 0x403   : > { %v1168_v3 = vcombine.low %v1143_v61, %v1151_v62  ;;  %v1184_v4 = vcombine.low %v1159_v63, %v1167_v1  ;;  %v1169_v5 = vcombine.high %v1143_v61, %v1151_v62  ;;  %v1185_v6 = vcombine.high %v1159_v63, %v1167_v1 }
 0x404   : > { %1556 = vst.msk [vmem:[%s3505_s30 + $0x18] sm:$0xff] %vm1204_vm2, %v1552_v2 }
 0x405   : > { %v1176_v7 = vrot.slane %v1168_v3, %v3425_v38  ;;  %v1192_v8 = vrot.slane %v1184_v4, %v3425_v38  ;;  %v1183_v9 = vrot.slane %v1169_v5, %v3425_v38  ;;  %v1199_v10 = vrot.slane %v1185_v6, %v3425_v38  ;;  %v1849_v38 = vld [vmem:[#allocation14] sm:$0xff] }
 0x407   : > { %v1200_v11 = vcombine.low %v1176_v7, %v1192_v8  ;;  %v1201_v12 = vcombine.high %v1176_v7, %v1192_v8  ;;  %v1202_v31 = vcombine.low %v1183_v9, %v1199_v10  ;;  %v1203_v13 = vcombine.high %v1183_v9, %v1199_v10 }
 0x409   : > { %2549 = vmatpush3.msra.mxu0 %v1200_v11  ;;  %2554 = vmatpush3.msra.mxu1 %v1201_v12 }
 0x40a   : > { %2551 = vmatmul.mubr.msk.f32.vlgmr.msra.gmra.mxu0 %vm1204_vm2, %v1549_v43  ;;  %2556 = vmatmul.mubr.msk.f32.vlgmr.msra.gmra.mxu1 %vm1204_vm2, %v1550_v54 }
 0x40b   : > { %2558 = vmatprep.subr.mxu0 %v3095_v0  ;;  %2563 = vmatprep.subr.mxu1 %v3095_v0 }
 0x40c   : > { %2559 = vmatpush3.msra.mxu0 %v1202_v31  ;;  %2564 = vmatpush3.msra.mxu1 %v1203_v13 }
 0x40d   : > { %2560 = vmatprep.mubr.msk.f32.mxu0 %vm3096_vm0, %v3095_v0  ;;  %2565 = vmatprep.mubr.msk.f32.mxu1 %vm3096_vm0, %v3095_v0 }
 0x40e   : > { %2561 = vmatmul.mubr.msk.f32.vlgmr.msra.gmra.mxu0 %vm1204_vm2, %v1551_v55  ;;  %2566 = vmatmul.mubr.msk.f32.vlgmr.msra.gmra.mxu1 %vm1204_vm2, %v1552_v2 }
 0x40f   : > { %2568 = vmatprep.subr.mxu0 %v3095_v0  ;;  %2573 = vmatprep.subr.mxu1 %v3095_v0 }
 0x410   : > { %2570 = vmatprep.mubr.msk.f32.mxu0 %vm3096_vm0, %v3095_v0  ;;  %2575 = vmatprep.mubr.msk.f32.mxu1 %vm3096_vm0, %v3095_v0 }
 0x411   : > { %2569 = vmatpush3.msra.mxu0 %v1849_v38  ;;  %2574 = vmatpush3.msra.mxu1 %v1850_v14 }
 0x412   : > { %2578 = vmatprep.subr.mxu0 %v3095_v0  ;;  %2583 = vmatprep.subr.mxu1 %v3095_v0 }
 0x4ca   : > { %v1626_v16 = vpop.f32.mrf.mxu0  ;;  %v1699_v17 = vpop.f32.mrf.mxu1 }
 0x4cb   : > { %2571 = vmatmul.mubr.msk.f32.vlgmr.msra.gmra.mxu0 %vm1204_vm2, %v1626_v16  ;;  %2576 = vmatmul.mubr.msk.f32.vlgmr.msra.gmra.mxu1 %vm1204_vm2, %v1699_v17 }
 0x4cc   : > { %v2552_v19 = vpop.f32.mrf.mxu0  ;;  %v2557_v20 = vpop.f32.mrf.mxu1  ;;  %2579 = vmatpush3.msra.mxu0 %v1851_v15  ;;  %2580 = vmatprep.mubr.msk.f32.mxu0 %vm3096_vm0, %v3095_v0 }
 0x4cd   : > { %2584 = vmatpush3.msra.mxu1 %v1852_v18  ;;  %2585 = vmatprep.mubr.msk.f32.mxu1 %vm3096_vm0, %v3095_v0 }
 0x4ce   : > { %v1772_v21 = vpop.f32.mrf.mxu0  ;;  %v1845_v22 = vpop.f32.mrf.mxu1 }
 0x4cf   : > { %2581 = vmatmul.mubr.msk.f32.vlgmr.msra.gmra.mxu0 %vm1204_vm2, %v1772_v21  ;;  %2586 = vmatmul.mubr.msk.f32.vlgmr.msra.gmra.mxu1 %vm1204_vm2, %v1845_v22 }
 0x4d0   : > { %v2562_v23 = vpop.f32.mrf.mxu0  ;;  %v2567_v24 = vpop.f32.mrf.mxu1 }
 0x4d1   : > { %2970 = shalt.err (!%p2967_p6)
}
 0x4d2   : > { %s2971_s3 = scalar_lea.hbm %s3558_s1, 512  ;;  %s2975_s19 = scalar_lea.hbm %s3640_s9, 1024 }
 0x4d3   : > { %p2972_p3 = scmp.ne.s32.totalorder %s3558_s1, %s2971_s3  ;;  %p2976_p12 = scmp.lt.s32.totalorder %s3558_s1, %s3640_s9 }
 0x4d4   : > { %p2977_p0 = scmp.lt.s32.totalorder %s2975_s19, %s2971_s3 }
 0x4d5   : > { %p2973_p10 = pnand %p2972_p3, %p3691_p1 }
 0x4d6   : > { %p2978_p8 = por %p2977_p0, %p2976_p12 }
 0x4d7   : > { %p2974_p13 = pneg %p2973_p10 }
 0x4d9   : > { %p2979_p2 = pnand %p2978_p8, %p2974_p13 }
 0x4db   : > { %2982 = shalt.err (!%p2979_p2)
}
 0x4dc   : > { %s3103_s13 = smov 128   ;;  %s3104_s23 = smov 8  }
 0x4dd   : > { %2615 = dma.vmem_to_hbm [thread:$0]  (%p3691_p1), %s3560_s29, 512, %s3558_s1, %s2159_s4, %s3103_s13, %s3103_s13, %s3104_s23  }
 0x4de   : > { %s2450_s30 = sshll.u32 %s3075_s12, 7  ;;  %s519_s14 = scalar_lea.vmem [#allocation16], %s3352_s21 }
 0x4df   : > { %s2173_s22 = sshll.u32 %s519_s14, 4  ;;  %s2171_s1 = scalar_lea.hbm %s3639_s8, %s2450_s30  ;;  %s2174_s22 = int_to_ptr.vmem [resolvable:$true] %s2173_s22 }
 0x4e0   : > { %s2154_s4 = scalar_lea.sflag [#allocation4], %s3349_s28  ;;  %s2983_s5 = scalar_lea.vmem %s2174_s22, 128 }
 0x4e1   : > { %p2984_p11 = scmp.ne.s32.totalorder %s2174_s22, %s2983_s5  ;;  %s3105_s12 = smov [#allocation16]  }
 0x4e2   : > { %s2987_s21 = sshll.u32 %s3105_s12, 4  ;;  %s2988_s21 = int_to_ptr.vmem [resolvable:$false] %s2987_s21 }
 0x4e3   : > { %p2985_p7 = pnand %p2984_p11, %p3691_p1  ;;  %s2989_s18 = scalar_lea.vmem %s2988_s21, 256 }
 0x4e4   : > { %p2990_p9 = scmp.lt.s32.totalorder %s2174_s22, %s2988_s21  ;;  %p2991_p4 = scmp.lt.s32.totalorder %s2989_s18, %s2983_s5 }
 0x4e5   : > { %p2986_p5 = pneg %p2985_p7 }
 0x4e6   : > { %p2992_p6 = por %p2991_p4, %p2990_p9 }
 0x4e8   : > { %p2993_p3 = pnand %p2992_p6, %p2986_p5 }
 0x58b   : > { %v1922_v0 = vpop.f32.mrf.mxu0  ;;  %v1995_v25 = vpop.f32.mrf.mxu1 }
 0x58c   : > { %v2145_v26 = vsel %vm537_vm1, %v1922_v0, 0.0  ;;  %v2146_v27 = vsel %vm537_vm1, %v1995_v25, 0.0 }
 0x58d   : > { %v2572_v28 = vpop.f32.mrf.mxu0  ;;  %v2577_v29 = vpop.f32.mrf.mxu1  ;;  %v2147_v30 = vadd.f32 %v2146_v27, %v2145_v26 }
 0x58f   : > { %v2068_v32 = vpop.f32.mrf.mxu0  ;;  %v2141_v33 = vpop.f32.mrf.mxu1 }
 0x590   : > { %v2148_v34 = vsel %vm537_vm1, %v2068_v32, 0.0  ;;  %v2150_v39 = vsel %vm537_vm1, %v2141_v33, 0.0 }
 0x591   : > { %v2149_v35 = vadd.f32 %v2148_v34, %v2147_v30  ;;  %v2582_v36 = vpop.f32.mrf.mxu0  ;;  %v2587_v37 = vpop.f32.mrf.mxu1 }
 0x593   : > { %v2151_v40 = vadd.f32 %v2150_v39, %v2149_v35 }
 0x595   : > { %2152 = vst.msk [vmem:[%s519_s14] sm:$0xff] %vm537_vm1, %v2151_v40 }
 0x596   : > { %2996 = shalt.err (!%p2993_p3)
}
 0x597   : > { %s2997_s20 = scalar_lea.hbm %s2171_s1, 128  ;;  %s3001_s3 = scalar_lea.hbm %s3639_s8, 256 }
 0x598   : > { %p2998_p10 = scmp.ne.s32.totalorder %s2171_s1, %s2997_s20  ;;  %p3002_p0 = scmp.lt.s32.totalorder %s2171_s1, %s3639_s8 }
 0x599   : > { %p3003_p8 = scmp.lt.s32.totalorder %s3001_s3, %s2997_s20 }
 0x59a   : > { %p2999_p13 = pnand %p2998_p10, %p3691_p1 }
 0x59b   : > { %p3004_p2 = por %p3003_p8, %p3002_p0 }
 0x59c   : > { %p3000_p12 = pneg %p2999_p13 }
 0x59e   : > { %p3005_p11 = pnand %p3004_p2, %p3000_p12 }
 0x5a0   : > { %3008 = shalt.err (!%p3005_p11)
}
 0x5a1   : > { %2614 = dma.vmem_to_hbm [thread:$0]  (%p3691_p1), %s2174_s22, 128, %s2171_s1, %s2154_s4  }
 0x5a2 PF: > { %s3692_s19 = sld [smem:[#allocation26_spill]] }
 0x5a3   : > { %s3693_s15 = sld [smem:[#allocation31_spill]] }
 0x5a4   : > { %s3694_s25 = sld [smem:[#allocation28_spill]] }
 0x5a8   : > { %s2202_s13 = sand.u32 1, %s3692_s19  }
 0x5a9   : > { %p3695_p7 = scmp.ne.s32.totalorder %s3693_s15, 0  ;;  %s2203_s23 = scalar_lea.sflag [#allocation4], %s2202_s13 }
 0x5aa   : > { %p3696_p5 = scmp.ge.s32.totalorder %s3694_s25, 2 }
 0x5ac   : > { %p2645_p9 = pnand %p3696_p5, %p3695_p7 }
 0x5ae   : > { %p2646_p4 = pneg %p2645_p9 }
 0x5b0   : > { %3054 = dma.done.wait (%p2646_p4), %s2203_s23, 128  }
 0x5b1   : > { %3056 = vsyncadd (%p2646_p4), %s2203_s23, 4294967168  ;;  %s2212_s30 = scalar_lea.sflag [#allocation18], %s2202_s13 }
 0x5b2   : > { %3058 = dma.done.wait (%p2646_p4), %s2212_s30, 512  }
 0x5b3   : > { %3060 = vsyncadd (%p2646_p4), %s2212_s30, 4294966784  ;;  %s35_s14 = sadd.s32 1, %s3694_s25   ;;  %s3697_s26 = sld [smem:[#allocation30_spill]] }
 0x5b4   : > { %p32_p6 = scmp.ge.s32.totalorder %s35_s14, 4   ;;  %s3698_s12 = sld [smem:[#allocation27_spill]] }
 0x5b5   : > { %s3699_s13 = sld [smem:[#allocation29_spill]]  ;;  %s3700_s30 = smov %s3067_s10 }
 0x5b6   : > { %s3701_s10 = smov %s3071_s11  ;;  %34 = sbr.rel (!%p32_p6) target bundleno = 18 (0x12), region = 159 }
 0x5b9   : > { %s3702_s11 = smov %s3697_s26 }
 0x5bb   :  { %2217 = vsyncpa [#allocation3], 1 }
 0x5bc   :  { %2219 = vsyncpa [#allocation3 + $0x1], 1 }
 0x5bd   :  { %2220 = vsyncpa [#allocation6], 1 }
 0x5be   :  { %2222 = vsyncpa [#allocation6 + $0x1], 1 }
 0x5bf   :  { %2223 = vsyncpa [#allocation9], 1 }
 0x5c0   :  { %2224 = vsyncpa [#allocation12], 1 }
 0x5c1   :  { %2225 = vsyncpa [#allocation15], 1 }
 0x5c2   :  { %2226 = vsyncpa [#allocation4], 1 }
 0x5c3   :  { %2228 = vsyncpa [#allocation4 + $0x1], 1 }
 0x5c4   :  { %2229 = vsyncpa [#allocation18], 1 }
 0x5c5   :  { %2231 = vsyncpa [#allocation18 + $0x1], 1 }

</bundles_post_ra>
